<compile_context>
chip_gen: v5e
topology: v5e:2x2
jax: 0.10.0
libtpu: 0.0.40
codegen_flags: <defaults>
</compile_context>

<pallas_src>
import jax
import jax.numpy as jnp
import numpy as np
from jax import lax
from jax.experimental import pallas as pl
from jax.experimental.pallas import tpu as pltpu

EMBED = 512
HID = 128
NSIGN = 16
NHEAD = 4
OUT_ALL = NHEAD * NSIGN  # 64


# ---------------------------------------------------------------------------
# Kernel: fused 4-head decoder (folded linears) + per-head argmax
# ---------------------------------------------------------------------------
def _decoder_heads_kernel(x_ref, w_ref, b_ref, scores_ref, idx_ref):
    """
    x_ref      : (TB, 512)       f32   embedding tile
    w_ref      : (512, 64)       bf16  folded + head-concatenated weights
    b_ref      : (1, 64)         f32   folded + head-concatenated bias
    scores_ref : (4, TB, 16)     f32   out
    idx_ref    : (4, TB)         i32   out (transposed to (B,4) in wrapper)
    """
    x = x_ref[...].astype(jnp.bfloat16)                      # (TB, 512)
    s_all = jnp.dot(x, w_ref[...],
                    preferred_element_type=jnp.float32) + b_ref[...]   # (TB, 64) f32

    idx_rows = []
    for h in range(NHEAD):                                   # static unrolled
        s = s_all[:, h * NSIGN:(h + 1) * NSIGN]              # (TB, 16) static slice
        scores_ref[h] = s
        # first-occurrence argmax (matches torch.argmax tie-break)
        m = jnp.max(s, axis=-1, keepdims=True)
        iota = lax.broadcasted_iota(jnp.int32, s.shape, 1)
        idx = jnp.min(jnp.where(s == m, iota, jnp.int32(NSIGN)), axis=-1)  # (TB,)
        idx_rows.append(idx)
    idx_ref[...] = jnp.stack(idx_rows, axis=0).astype(jnp.int32)           # (4, TB)


def watermark_decoder_heads(x, w_all, b_all):
    """x: (B, 512) f32 embedding.  Returns (scores (4,B,16) f32, sign_g_hat (B,4) i32)."""
    B = x.shape[0]
    TB = B if B <= 128 else 128          # batch tile (full batch when small)
    grid = (pl.cdiv(B, TB),)

    scores, idx = pl.pallas_call(
        _decoder_heads_kernel,
        out_shape=(
            jax.ShapeDtypeStruct((NHEAD, B, NSIGN), jnp.float32),
            jax.ShapeDtypeStruct((NHEAD, B), jnp.int32),
        ),
        grid=grid,
        in_specs=[
            pl.BlockSpec((TB, EMBED),     lambda i: (i, 0)),   # batch-tiled x
            pl.BlockSpec((EMBED, OUT_ALL), lambda i: (0, 0)),  # weights stay resident
            pl.BlockSpec((1, OUT_ALL),     lambda i: (0, 0)),
        ],
        out_specs=(
            pl.BlockSpec((NHEAD, TB, NSIGN), lambda i: (0, i, 0)),
            pl.BlockSpec((NHEAD, TB),        lambda i: (0, i)),
        ),
        compiler_params=pltpu.CompilerParams(
            dimension_semantics=("parallel",)),
    )(x, w_all, b_all)
    return scores, idx.T                                       # (4,B,16), (B,4)


# ---------------------------------------------------------------------------
# Parameter construction (deterministic, weight-norm parameterization)
# ---------------------------------------------------------------------------
def _init_linear(key, in_f, out_f):
    """nn.Linear default init + weight_norm (w = g * v / ||v||, norm over dim=1)."""
    kv, kg, kb = jax.random.split(key, 3)
    bound = 1.0 / np.sqrt(in_f)
    v = jax.random.uniform(kv, (out_f, in_f), jnp.float32, -bound, bound)
    g = jax.random.uniform(kg, (out_f,), jnp.float32, 0.5, 1.5)
    b = jax.random.uniform(kb, (out_f,), jnp.float32, -bound, bound)
    w_eff = g[:, None] * v / jnp.linalg.norm(v, axis=1, keepdims=True)
    return w_eff, b


def make_params(key):
    """Returns the raw (unfolded, pre-transposed) per-head weights."""
    keys = jax.random.split(key, 2 * NHEAD)
    w1_list, b1_list, w2_list, b2_list = [], [], [], []
    for h in range(NHEAD):
        w1, b1 = _init_linear(keys[2 * h],     EMBED, HID)     # (128, 512), (128,)
        w2, b2 = _init_linear(keys[2 * h + 1], HID,   NSIGN)   # (16, 128), (16,)
        w1_list.append(w1.T)                  # (512, 128)
        b1_list.append(b1[None, :])           # (1, 128)
        w2_list.append(w2.T)                  # (128, 16)
        b2_list.append(b2[None, :])           # (1, 16)
    return (jnp.stack(w1_list), jnp.stack(b1_list),
            jnp.stack(w2_list), jnp.stack(b2_list))


def fold_params(w1t, b1, w2t, b2):
    """Host-side fold: per-head W_eff=(512,16), b_eff=(1,16), then head-concat.

    w1t:(4,512,128) b1:(4,1,128) w2t:(4,128,16) b2:(4,1,16)
    -> W_all:(512,64) bf16, b_all:(1,64) f32 with head h at columns [16h:16h+16].
    """
    w_eff = jnp.einsum('hij,hjk->hik', w1t, w2t)            # (4, 512, 16) f32
    b_eff = jnp.einsum('hoj,hjk->hok', b1, w2t) + b2        # (4, 1, 16)   f32
    w_all = jnp.transpose(w_eff, (1, 0, 2)).reshape(EMBED, OUT_ALL)
    b_all = jnp.transpose(b_eff, (1, 0, 2)).reshape(1, OUT_ALL)
    return w_all.astype(jnp.bfloat16), b_all.astype(jnp.float32)


def _reference_f32(x, w1t, b1, w2t, b2):
    """Unfolded f32 reference matching the PyTorch forward exactly."""
    scores, idxs = [], []
    for h in range(NHEAD):
        s = (x @ w1t[h] + b1[h]) @ w2t[h] + b2[h]
        scores.append(s)
        idxs.append(jnp.argmax(s, axis=1))
    return jnp.stack(scores, 0), jnp.stack(idxs, 1).astype(jnp.int32)


if __name__ == "__main__":
    key = jax.random.PRNGKey(0)
    kx, kp = jax.random.split(key)

    B = 2
    # Embedding produced by the (external) ResNet221 backbone: x = recover(mel)[-1]
    x = jax.random.normal(kx, (B, EMBED), jnp.float32)
    w1t, b1, w2t, b2 = make_params(kp)
    w_all, b_all = fold_params(w1t, b1, w2t, b2)

    scores, sign_g_hat = watermark_decoder_heads(x, w_all, b_all)
    scores = jax.block_until_ready(scores)
    sign_g_hat = jax.block_until_ready(sign_g_hat)

    # Scores match the unfolded f32 reference within bf16-weight tolerance.
    ref_scores, ref_idx = _reference_f32(x, w1t, b1, w2t, b2)
    np.testing.assert_allclose(np.asarray(scores), np.asarray(ref_scores),
                               rtol=5e-2, atol=5e-2)
    # Indices are exactly the (first-occurrence) argmax of the returned scores.
    idx_from_scores = jnp.argmax(scores, axis=-1).T.astype(jnp.int32)   # (B, 4)
    np.testing.assert_array_equal(np.asarray(sign_g_hat),
                                  np.asarray(idx_from_scores))

    assert scores.shape == (NHEAD, B, NSIGN)
    assert sign_g_hat.shape == (B, NHEAD)
    print("KERNEL_OK")
</pallas_src>

<mosaic_0001>
module attributes {stable_mosaic.version = 11 : i64} {
  func.func @_decoder_heads_kernel(%arg0: i32, %arg1: memref<2x512xf32, #tpu.memory_space<vmem>>, %arg2: memref<512x64xbf16, #tpu.memory_space<vmem>>, %arg3: memref<1x64xf32, #tpu.memory_space<vmem>>, %arg4: memref<4x2x16xf32, #tpu.memory_space<vmem>>, %arg5: memref<4x2xi32, #tpu.memory_space<vmem>>) attributes {dimension_semantics = [#tpu.dimension_semantics<parallel>], iteration_bounds = array<i64: 1>, scalar_prefetch = 0 : i64, scratch_operands = 0 : i64, tpu.core_type = #tpu.core_type<tc>, window_params = [{transform_indices = @transform_0, window_bounds = array<i64: 2, 512>}, {pipeline_mode = #tpu.pipeline_mode<synchronous>, transform_indices = @transform_1, window_bounds = array<i64: 512, 64>}, {pipeline_mode = #tpu.pipeline_mode<synchronous>, transform_indices = @transform_2, window_bounds = array<i64: 1, 64>}, {transform_indices = @transform_3, window_bounds = array<i64: 4, 2, 16>}, {transform_indices = @transform_4, window_bounds = array<i64: 4, 2>}]} {
    %c0 = arith.constant 0 : index
    %c0_0 = arith.constant 0 : index
    %0 = vector.load %arg1[%c0, %c0_0] : memref<2x512xf32, #tpu.memory_space<vmem>>, vector<2x512xf32>
    %1 = arith.truncf %0 : vector<2x512xf32> to vector<2x512xbf16>
    %c0_1 = arith.constant 0 : index
    %c0_2 = arith.constant 0 : index
    %2 = vector.load %arg2[%c0_1, %c0_2] : memref<512x64xbf16, #tpu.memory_space<vmem>>, vector<512x64xbf16>
    %cst = arith.constant dense<0.000000e+00> : vector<2x64xf32>
    %3 = tpu.matmul %1, %2, %cst {dimension_numbers = #tpu.dot_dimension_numbers<[1], [0], [0], [1], [0, 0, 1, 1], [], []>} : vector<2x512xbf16>, vector<512x64xbf16>, vector<2x64xf32> -> vector<2x64xf32>
    %c0_3 = arith.constant 0 : index
    %c0_4 = arith.constant 0 : index
    %4 = vector.load %arg3[%c0_3, %c0_4] : memref<1x64xf32, #tpu.memory_space<vmem>>, vector<1x64xf32>
    %5 = vector.broadcast %4 : vector<1x64xf32> to vector<2x64xf32>
    %6 = arith.addf %3, %5 : vector<2x64xf32>
    %7 = vector.extract_strided_slice %6 {offsets = [0, 0], sizes = [2, 16], strides = [1, 1]} : vector<2x64xf32> to vector<2x16xf32>
    %c0_5 = arith.constant 0 : index
    %c0_6 = arith.constant 0 : index
    %c0_7 = arith.constant 0 : index
    %8 = vector.load %arg4[%c0_5, %c0_6, %c0_7] : memref<4x2x16xf32, #tpu.memory_space<vmem>>, vector<1x2x16xf32>
    %9 = vector.shape_cast %8 : vector<1x2x16xf32> to vector<2x16xf32>
    %10 = vector.shape_cast %7 : vector<2x16xf32> to vector<1x2x16xf32>
    tpu.vector_store %arg4[%c0_5, %c0_6, %c0_7], %10 {strides = array<i32>} : memref<4x2x16xf32, #tpu.memory_space<vmem>>, vector<1x2x16xf32>,
    %cst_8 = arith.constant dense<0xFF800000> : vector<2xf32>
    %11 = vector.multi_reduction <maximumf>, %7, %cst_8 [1] : vector<2x16xf32> to vector<2xf32>
    %12 = vector.shape_cast %11 : vector<2xf32> to vector<2x1xf32>
    %13 = tpu.iota {dimensions = array<i32: 1>} : vector<2x16xi32>
    %14 = vector.broadcast %12 : vector<2x1xf32> to vector<2x16xf32>
    %15 = arith.cmpf oeq, %7, %14 : vector<2x16xf32>
    %c16_i32 = arith.constant 16 : i32
    %16 = vector.broadcast %c16_i32 : i32 to vector<2x16xi32>
    %17 = arith.select %15, %13, %16 : vector<2x16xi1>, vector<2x16xi32>
    %cst_9 = arith.constant dense<2147483647> : vector<2xi32>
    %18 = vector.multi_reduction <minsi>, %17, %cst_9 [1] : vector<2x16xi32> to vector<2xi32>
    %19 = vector.extract_strided_slice %6 {offsets = [0, 16], sizes = [2, 16], strides = [1, 1]} : vector<2x64xf32> to vector<2x16xf32>
    %c1 = arith.constant 1 : index
    %c0_10 = arith.constant 0 : index
    %c0_11 = arith.constant 0 : index
    %20 = vector.load %arg4[%c1, %c0_10, %c0_11] : memref<4x2x16xf32, #tpu.memory_space<vmem>>, vector<1x2x16xf32>
    %21 = vector.shape_cast %20 : vector<1x2x16xf32> to vector<2x16xf32>
    %22 = vector.shape_cast %19 : vector<2x16xf32> to vector<1x2x16xf32>
    tpu.vector_store %arg4[%c1, %c0_10, %c0_11], %22 {strides = array<i32>} : memref<4x2x16xf32, #tpu.memory_space<vmem>>, vector<1x2x16xf32>,
    %cst_12 = arith.constant dense<0xFF800000> : vector<2xf32>
    %23 = vector.multi_reduction <maximumf>, %19, %cst_12 [1] : vector<2x16xf32> to vector<2xf32>
    %24 = vector.shape_cast %23 : vector<2xf32> to vector<2x1xf32>
    %25 = tpu.iota {dimensions = array<i32: 1>} : vector<2x16xi32>
    %26 = vector.broadcast %24 : vector<2x1xf32> to vector<2x16xf32>
    %27 = arith.cmpf oeq, %19, %26 : vector<2x16xf32>
    %c16_i32_13 = arith.constant 16 : i32
    %28 = vector.broadcast %c16_i32_13 : i32 to vector<2x16xi32>
    %29 = arith.select %27, %25, %28 : vector<2x16xi1>, vector<2x16xi32>
    %cst_14 = arith.constant dense<2147483647> : vector<2xi32>
    %30 = vector.multi_reduction <minsi>, %29, %cst_14 [1] : vector<2x16xi32> to vector<2xi32>
    %31 = vector.extract_strided_slice %6 {offsets = [0, 32], sizes = [2, 16], strides = [1, 1]} : vector<2x64xf32> to vector<2x16xf32>
    %c2 = arith.constant 2 : index
    %c0_15 = arith.constant 0 : index
    %c0_16 = arith.constant 0 : index
    %32 = vector.load %arg4[%c2, %c0_15, %c0_16] : memref<4x2x16xf32, #tpu.memory_space<vmem>>, vector<1x2x16xf32>
    %33 = vector.shape_cast %32 : vector<1x2x16xf32> to vector<2x16xf32>
    %34 = vector.shape_cast %31 : vector<2x16xf32> to vector<1x2x16xf32>
    tpu.vector_store %arg4[%c2, %c0_15, %c0_16], %34 {strides = array<i32>} : memref<4x2x16xf32, #tpu.memory_space<vmem>>, vector<1x2x16xf32>,
    %cst_17 = arith.constant dense<0xFF800000> : vector<2xf32>
    %35 = vector.multi_reduction <maximumf>, %31, %cst_17 [1] : vector<2x16xf32> to vector<2xf32>
    %36 = vector.shape_cast %35 : vector<2xf32> to vector<2x1xf32>
    %37 = tpu.iota {dimensions = array<i32: 1>} : vector<2x16xi32>
    %38 = vector.broadcast %36 : vector<2x1xf32> to vector<2x16xf32>
    %39 = arith.cmpf oeq, %31, %38 : vector<2x16xf32>
    %c16_i32_18 = arith.constant 16 : i32
    %40 = vector.broadcast %c16_i32_18 : i32 to vector<2x16xi32>
    %41 = arith.select %39, %37, %40 : vector<2x16xi1>, vector<2x16xi32>
    %cst_19 = arith.constant dense<2147483647> : vector<2xi32>
    %42 = vector.multi_reduction <minsi>, %41, %cst_19 [1] : vector<2x16xi32> to vector<2xi32>
    %43 = vector.extract_strided_slice %6 {offsets = [0, 48], sizes = [2, 16], strides = [1, 1]} : vector<2x64xf32> to vector<2x16xf32>
    %c3 = arith.constant 3 : index
    %c0_20 = arith.constant 0 : index
    %c0_21 = arith.constant 0 : index
    %44 = vector.load %arg4[%c3, %c0_20, %c0_21] : memref<4x2x16xf32, #tpu.memory_space<vmem>>, vector<1x2x16xf32>
    %45 = vector.shape_cast %44 : vector<1x2x16xf32> to vector<2x16xf32>
    %46 = vector.shape_cast %43 : vector<2x16xf32> to vector<1x2x16xf32>
    tpu.vector_store %arg4[%c3, %c0_20, %c0_21], %46 {strides = array<i32>} : memref<4x2x16xf32, #tpu.memory_space<vmem>>, vector<1x2x16xf32>,
    %cst_22 = arith.constant dense<0xFF800000> : vector<2xf32>
    %47 = vector.multi_reduction <maximumf>, %43, %cst_22 [1] : vector<2x16xf32> to vector<2xf32>
    %48 = vector.shape_cast %47 : vector<2xf32> to vector<2x1xf32>
    %49 = tpu.iota {dimensions = array<i32: 1>} : vector<2x16xi32>
    %50 = vector.broadcast %48 : vector<2x1xf32> to vector<2x16xf32>
    %51 = arith.cmpf oeq, %43, %50 : vector<2x16xf32>
    %c16_i32_23 = arith.constant 16 : i32
    %52 = vector.broadcast %c16_i32_23 : i32 to vector<2x16xi32>
    %53 = arith.select %51, %49, %52 : vector<2x16xi1>, vector<2x16xi32>
    %cst_24 = arith.constant dense<2147483647> : vector<2xi32>
    %54 = vector.multi_reduction <minsi>, %53, %cst_24 [1] : vector<2x16xi32> to vector<2xi32>
    %55 = vector.shape_cast %18 : vector<2xi32> to vector<1x2xi32>
    %56 = vector.shape_cast %30 : vector<2xi32> to vector<1x2xi32>
    %57 = vector.shape_cast %42 : vector<2xi32> to vector<1x2xi32>
    %58 = vector.shape_cast %54 : vector<2xi32> to vector<1x2xi32>
    %59 = tpu.concatenate %55, %56, %57, %58 in 0 : vector<1x2xi32>, vector<1x2xi32>, vector<1x2xi32>, vector<1x2xi32> -> vector<4x2xi32>
    %c0_25 = arith.constant 0 : index
    %c0_26 = arith.constant 0 : index
    %60 = vector.load %arg5[%c0_25, %c0_26] : memref<4x2xi32, #tpu.memory_space<vmem>>, vector<4x2xi32>
    tpu.vector_store %arg5[%c0_25, %c0_26], %59 {strides = array<i32>} : memref<4x2xi32, #tpu.memory_space<vmem>>, vector<4x2xi32>,
    return
  }
  func.func @transform_0(%arg0: i32) -> (i32, i32) {
    %c0_i32 = arith.constant 0 : i32
    %c0_i32_0 = arith.constant 0 : i32
    return %arg0, %c0_i32 : i32, i32
  }
  func.func @transform_1(%arg0: i32) -> (i32, i32) {
    %c0_i32 = arith.constant 0 : i32
    %c0_i32_0 = arith.constant 0 : i32
    %c0_i32_1 = arith.constant 0 : i32
    return %c0_i32, %c0_i32_0 : i32, i32
  }
  func.func @transform_2(%arg0: i32) -> (i32, i32) {
    %c0_i32 = arith.constant 0 : i32
    %c0_i32_0 = arith.constant 0 : i32
    %c0_i32_1 = arith.constant 0 : i32
    return %c0_i32, %c0_i32_0 : i32, i32
  }
  func.func @transform_3(%arg0: i32) -> (i32, i32, i32) {
    %c0_i32 = arith.constant 0 : i32
    %c0_i32_0 = arith.constant 0 : i32
    %c0_i32_1 = arith.constant 0 : i32
    return %c0_i32, %arg0, %c0_i32_0 : i32, i32, i32
  }
  func.func @transform_4(%arg0: i32) -> (i32, i32) {
    %c0_i32 = arith.constant 0 : i32
    %c0_i32_0 = arith.constant 0 : i32
    return %c0_i32, %arg0 : i32, i32
  }
}

</mosaic_0001>

<bundles_post_ra>
// kernel: tpu_custom_call.1
= control target key start
LH: loop header
LB: loop body
LE: loop exit
PB: predicated region body
PF: predicated region fallthrough
CT: control target
= control target key end

     0   :  { %v349_v6 = vlaneseq  ;;  %s682_s13 = smov 16   ;;  %s862_s0 = inlined_call_operand.vmem [shape: f32[2,512], index: 0, kind: input, shape index: {}]   ;;  %s863_s1 = inlined_call_operand.vmem [shape: bf16[512,64], index: 1, kind: input, shape index: {}]   ;;  %s864_s2 = inlined_call_operand.vmem [shape: f32[1,64], index: 2, kind: input, shape index: {}]   ;;  %s865_s3 = inlined_call_operand.hbm [shape: f32[4,2,16], index: 3, kind: output, shape index: {0}]   ;;  %s866_s4 = inlined_call_operand.vmem [shape: s32[4,2], index: 4, kind: output, shape index: {1}]  }
   0x1   :  { %v622_v0 = vld [vmem:[%s863_s1 + $0x38] sm:$0xff]  ;;  %v621_v4 = vld [vmem:[%s863_s1 + $0x30] sm:$0xff]  ;;  %v620_v10 = vld [vmem:[%s863_s1 + $0x28] sm:$0xff] }
   0x2   :  { %v630_v1 = vld [vmem:[%s863_s1 + $0x78] sm:$0xff]  ;;  %292 = vmatpush.bf16.msra.mxu0 %v622_v0  ;;  %v629_v5 = vld [vmem:[%s863_s1 + $0x70] sm:$0xff]  ;;  %v739_v9 = vand.u32 127, %v349_v6  ;;  %v628_v11 = vld [vmem:[%s863_s1 + $0x68] sm:$0xff] }
   0x3   :  { %v638_v2 = vld [vmem:[%s863_s1 + $0xb8] sm:$0xff]  ;;  %305 = vmatpush.bf16.msra.mxu1 %v630_v1  ;;  %v637_v7 = vld [vmem:[%s863_s1 + $0xb0] sm:$0xff]  ;;  %v636_v12 = vld [vmem:[%s863_s1 + $0xa8] sm:$0xff] }
   0x4   :  { %v646_v3 = vld [vmem:[%s863_s1 + $0xf8] sm:$0xff]  ;;  %318 = vmatpush.bf16.msra.mxu2 %v638_v2  ;;  %v645_v8 = vld [vmem:[%s863_s1 + $0xf0] sm:$0xff]  ;;  %v644_v13 = vld [vmem:[%s863_s1 + $0xe8] sm:$0xff]  ;;  %379 = vrot.lane.b32.xlu2 %v739_v9, %s682_s13 }
   0x5   :  { %331 = vmatpush.bf16.msra.mxu3 %v646_v3  ;;  %v619_v14 = vld [vmem:[%s863_s1 + $0x20] sm:$0xff] }
   0x6   :  { %293 = vmatpush.bf16.msra.mxu0 %v621_v4  ;;  %v627_v15 = vld [vmem:[%s863_s1 + $0x60] sm:$0xff] }
   0x7   :  { %306 = vmatpush.bf16.msra.mxu1 %v629_v5  ;;  %v17_v16 = vld [vmem:[%s862_s0] sm:$0xff] }
   0x8   :  { %319 = vmatpush.bf16.msra.mxu2 %v637_v7  ;;  %v635_v17 = vld [vmem:[%s863_s1 + $0xa0] sm:$0xff]  ;;  %19 = vst [vmem:[#allocation1] ss:$4 sm:$0xff] %v17_v16 }
   0x9   :  { %332 = vmatpush.bf16.msra.mxu3 %v645_v8  ;;  %v643_v18 = vld [vmem:[%s863_s1 + $0xe0] sm:$0xff] }
   0xa   :  { %294 = vmatpush.bf16.msra.mxu0 %v620_v10 }
   0xb   :  { %307 = vmatpush.bf16.msra.mxu1 %v628_v11 }
   0xc   :  { %320 = vmatpush.bf16.msra.mxu2 %v636_v12 }
   0xd   :  { %333 = vmatpush.bf16.msra.mxu3 %v644_v13 }
   0xe   :  { %10 = vsyncpa [#allocation3], 0  ;;  %295 = vmatpush.bf16.msra.mxu0 %v619_v14  ;;  %v618_v19 = vld [vmem:[%s863_s1 + $0x18] sm:$0xff]  ;;  %v617_v23 = vld [vmem:[%s863_s1 + $0x10] sm:$0xff]  ;;  %vm430_vm0 = vcmask 517504   ;;  %vm374_vm1 = vcmask 255104  }
   0xf   :  { %308 = vmatpush.bf16.msra.mxu1 %v627_v15  ;;  %v626_v20 = vld [vmem:[%s863_s1 + $0x58] sm:$0xff]  ;;  %v625_v24 = vld [vmem:[%s863_s1 + $0x50] sm:$0xff]  ;;  %v616_v27 = vld [vmem:[%s863_s1 + $0x8] sm:$0xff]  ;;  %vm344_vm2 = vcmask 123904   ;;  %vm402_vm3 = vcmask 386304   ;;  %s684_s29 = smov 48  }
  0x10   :  { %321 = vmatpush.bf16.msra.mxu2 %v635_v17  ;;  %v634_v21 = vld [vmem:[%s863_s1 + $0x98] sm:$0xff]  ;;  %v633_v25 = vld [vmem:[%s863_s1 + $0x90] sm:$0xff]  ;;  %v624_v28 = vld [vmem:[%s863_s1 + $0x48] sm:$0xff]  ;;  %s685_s30 = smov 96   ;;  %s686_s5 = smov 112   ;;  %vm457_vm12 = vcmask 1040384  }
  0x11   :  { %334 = vmatpush.bf16.msra.mxu3 %v643_v18  ;;  %v642_v22 = vld [vmem:[%s863_s1 + $0xd8] sm:$0xff]  ;;  %v641_v26 = vld [vmem:[%s863_s1 + $0xd0] sm:$0xff]  ;;  %v632_v29 = vld [vmem:[%s863_s1 + $0x88] sm:$0xff]  ;;  %s687_s6 = smov 80   ;;  %vm459_vm13 = vcmask 1041408   ;;  %s688_s7 = smov [#allocation2]  }
  0x12   :  { %296 = vmatpush.bf16.msra.mxu0 %v618_v19  ;;  %v640_v30 = vld [vmem:[%s863_s1 + $0xc8] sm:$0xff]  ;;  %v615_v31 = vld [vmem:[%s863_s1] sm:$0xff]  ;;  %v22_v37 = vld.sshfl [vmem:[#allocation1 + $0x10] sm:$0xff pattern:$0x73625140]  ;;  %s469_s8 = sshll.u32 %s688_s7, 4  ;;  %s470_s8 = int_to_ptr.vmem [resolvable:$true] %s469_s8 }
  0x13   :  { %309 = vmatpush.bf16.msra.mxu1 %v626_v20  ;;  %v623_v32 = vld [vmem:[%s863_s1 + $0x40] sm:$0xff]  ;;  %v21_v36 = vld.sshfl [vmem:[#allocation1 + $0x8] sm:$0xff pattern:$0x73625140]  ;;  %v30_v41 = vpack.c.bf16 %v22_v37, %v22_v37  ;;  %vm461_vm14 = vcmask 1042432   ;;  %s471_s11 = sshll.u32 %s865_s3, 4  ;;  %s472_s11 = int_to_ptr.hbm [resolvable:$true] %s471_s11 }
  0x14   :  { %322 = vmatpush.bf16.msra.mxu2 %v634_v21  ;;  %v631_v33 = vld [vmem:[%s863_s1 + $0x80] sm:$0xff]  ;;  %v23_v38 = vld.sshfl [vmem:[#allocation1 + $0x18] sm:$0xff pattern:$0x73625140]  ;;  %v29_v40 = vpack.c.bf16 %v21_v36, %v21_v36  ;;  %vm463_vm15 = vcmask 11264   ;;  %s689_s14 = smov 2  }
  0x15   :  { %335 = vmatpush.bf16.msra.mxu3 %v642_v22  ;;  %v639_v34 = vld [vmem:[%s863_s1 + $0xc0] sm:$0xff]  ;;  %v31_v42 = vpack.c.bf16 %v23_v38, %v23_v38 }
  0x16   :  { %297 = vmatpush.bf16.msra.mxu0 %v617_v23  ;;  %v20_v35 = vld.sshfl [vmem:[#allocation1] sm:$0xff pattern:$0x73625140] }
  0x17   :  { %310 = vmatpush.bf16.msra.mxu1 %v625_v24  ;;  %v28_v39 = vpack.c.bf16 %v20_v35, %v20_v35  ;;  %v655_v43 = vld [vmem:[%s864_s2] ss:$0 sm:$0xff]  ;;  %s683_s2 = smov 32  }
  0x18   :  { %323 = vmatpush.bf16.msra.mxu2 %v633_v25 }
  0x19   :  { %336 = vmatpush.bf16.msra.mxu3 %v641_v26 }
  0x1a   :  { %298 = vmatpush.bf16.msra.mxu0 %v616_v27 }
  0x1b   :  { %311 = vmatpush.bf16.msra.mxu1 %v624_v28 }
  0x1c   :  { %324 = vmatpush.bf16.msra.mxu2 %v632_v29 }
  0x1d   :  { %337 = vmatpush.bf16.msra.mxu3 %v640_v30 }
  0x1e   :  { %299 = vmatpush.bf16.msra.mxu0 %v615_v31 }
  0x1f   :  { %312 = vmatpush.bf16.msra.mxu1 %v623_v32 }
  0x20   :  { %325 = vmatpush.bf16.msra.mxu2 %v631_v33 }
  0x21   :  { %338 = vmatpush.bf16.msra.mxu3 %v639_v34  ;;  %300 = vmatmul.bf16.vlgmr.msra.gmra.mxu0 %v28_v39 }
  0x22   :  { %313 = vmatmul.bf16.vlgmr.msra.gmra.mxu1 %v29_v40 }
  0x23   :  { %326 = vmatmul.bf16.vlgmr.msra.gmra.mxu2 %v30_v41 }
  0x24   :  { %339 = vmatmul.bf16.vlgmr.msra.gmra.mxu3 %v31_v42 }
  0x5e   :  { %v380_v61 = vpop.permute.xlu2 %379 }
  0x9e   :  { %v301_v44 = vpop.f32.mrf.mxu0 }
  0x9f   :  { %v314_v45 = vpop.f32.mrf.mxu1  ;;  %v302_v46 = vadd.f32 %v655_v43, %v301_v44 }
  0xa1   :  { %v315_v47 = vadd.f32 %v314_v45, %v302_v46 }
  0xa6   :  { %v327_v48 = vpop.f32.mrf.mxu2  ;;  %v303_v51 = vpop.f32.mrf.mxu0 }
  0xa7   :  { %v340_v49 = vpop.f32.mrf.mxu3  ;;  %v328_v50 = vadd.f32 %v327_v48, %v315_v47  ;;  %v316_v52 = vpop.f32.mrf.mxu1 }
  0xa9   :  { %v820_v53 = vadd.f32 %v340_v49, %v328_v50 }
  0xab   :  { %v431_v54 = vsel %vm430_vm0, %v820_v53, -inf  ;;  %v375_v55 = vsel %vm374_vm1, %v820_v53, -inf  ;;  %v346_v56 = vsel %vm344_vm2, %v820_v53, -inf  ;;  %345 = vst.msk [vmem:[#allocation2] sm:$0x3] %vm344_vm2, %v820_v53  ;;  %v403_v59 = vsel %vm402_vm3, %v820_v53, -inf }
  0xac   :  { %432 = vmax.xlane.f32.xlu2 %v431_v54  ;;  %376 = vmax.xlane.f32.xlu1 %v375_v55 }
  0xad   :  { %347 = vmax.xlane.f32.xlu0 %v346_v56 }
  0xae   :  { %v329_v57 = vpop.f32.mrf.mxu2 }
  0xaf   :  { %v342_v58 = vpop.f32.mrf.mxu3 }
  0xb4   :  { %404 = vmax.xlane.f32.xlu1 %v403_v59 }
  0xc1   :  { %407 = vrot.lane.b32.xlu0 %v739_v9, %s683_s2 }
  0xcd   :  { %435 = vrot.lane.b32.xlu1 %v739_v9, %s684_s29 }
 0x11f   :  { %v377_v60 = vpop.xlane.xlu1 %376  ;;  %v433_v14 = vpop.xlane.xlu2 %432 }
 0x120   :  { %vm378_vm4 = vcmp.eq.f32.partialorder %v820_v53, %v377_v60  ;;  %v348_v62 = vpop.xlane.xlu0 %347  ;;  %vm434_vm7 = vcmp.eq.f32.partialorder %v820_v53, %v433_v14 }
 0x121   :  { %v381_v63 = vsel %vm378_vm4, %v380_v61, 16  ;;  %vm351_vm5 = vcmp.eq.f32.partialorder %v820_v53, %v348_v62 }
 0x122   :  { %v382_v0 = vsel %vm374_vm1, %v381_v63, 2147483647  ;;  %v352_v1 = vsel %vm351_vm5, %v739_v9, 16 }
 0x123   :  { %v353_v2 = vsel %vm344_vm2, %v352_v1, 2147483647  ;;  %v384_v3 = vshra.s32 %v382_v0, 16  ;;  %v383_v25 = vand.u32 65535, %v382_v0 }
 0x124   :  { %v355_v4 = vshra.s32 %v353_v2, 16  ;;  %v354_v20 = vand.u32 65535, %v353_v2 }
 0x125   :  { %v386_v5 = vcvt.s32.f32 %v384_v3  ;;  %v385_v26 = vcvt.s32.f32 %v383_v25 }
 0x126   :  { %v357_v6 = vcvt.s32.f32 %v355_v4  ;;  %v356_v22 = vcvt.s32.f32 %v354_v20 }
 0x127   :  { %387 = vmin.xlane.f32.xlu1 %v386_v5  ;;  %v405_v7 = vpop.xlane.xlu1 %404 }
 0x128   :  { %358 = vmin.xlane.f32.xlu0 %v357_v6  ;;  %vm406_vm6 = vcmp.eq.f32.partialorder %v820_v53, %v405_v7 }
 0x133   :  { %v408_v8 = vpop.permute.xlu0 %407 }
 0x134   :  { %v409_v10 = vsel %vm406_vm6, %v408_v8, 16 }
 0x135   :  { %v410_v11 = vsel %vm402_vm3, %v409_v10, 2147483647 }
 0x136   :  { %v412_v12 = vshra.s32 %v410_v11, 16  ;;  %v411_v28 = vand.u32 65535, %v410_v11 }
 0x138   :  { %v414_v13 = vcvt.s32.f32 %v412_v12  ;;  %v413_v30 = vcvt.s32.f32 %v411_v28 }
 0x13a   :  { %415 = vmin.xlane.f32.xlu2 %v414_v13 }
 0x13f   :  { %v436_v15 = vpop.permute.xlu1 %435 }
 0x140   :  { %v437_v16 = vsel %vm434_vm7, %v436_v15, 16  ;;  %397 = vrot.lane.b32.xlu1 %v820_v53, %s685_s30 }
 0x141   :  { %v438_v17 = vsel %vm430_vm0, %v437_v16, 2147483647 }
 0x142   :  { %v440_v18 = vshra.s32 %v438_v17, 16  ;;  %v439_v33 = vand.u32 65535, %v438_v17 }
 0x144   :  { %v442_v19 = vcvt.s32.f32 %v440_v18  ;;  %v441_v35 = vcvt.s32.f32 %v439_v33 }
 0x146   :  { %443 = vmin.xlane.f32.xlu2 %v442_v19 }
 0x15e   :  { %369 = vrot.lane.b32.xlu2 %v820_v53, %s686_s5 }
 0x19a   :  { %v388_v24 = vpop.xlane.xlu1 %387 }
 0x19b   :  { %v359_v21 = vpop.xlane.xlu0 %358  ;;  %vm389_vm9 = vcmp.eq.f32.partialorder %v386_v5, %v388_v24  ;;  %v394_v40 = vcvt.f32.s32 %v388_v24 }
 0x19c   :  { %vm360_vm8 = vcmp.eq.f32.partialorder %v357_v6, %v359_v21  ;;  %v390_v27 = vsel %vm389_vm9, %v385_v26, inf  ;;  %v365_v41 = vcvt.f32.s32 %v359_v21 }
 0x19d   :  { %v361_v23 = vsel %vm360_vm8, %v356_v22, inf  ;;  %v395_v43 = vshll.u32 %v394_v40, 16 }
 0x19e   :  { %362 = vmin.xlane.f32.xlu0 %v361_v23  ;;  %v366_v46 = vshll.u32 %v365_v41, 16 }
 0x1a6   :  { %391 = vmin.xlane.f32.xlu0 %v390_v27 }
 0x1ad   :  { %v416_v29 = vpop.xlane.xlu2 %415 }
 0x1ae   :  { %vm417_vm10 = vcmp.eq.f32.partialorder %v414_v13, %v416_v29  ;;  %v422_v45 = vcvt.f32.s32 %v416_v29 }
 0x1af   :  { %v418_v31 = vsel %vm417_vm10, %v413_v30, inf }
 0x1b0   :  { %419 = vmin.xlane.f32.xlu0 %v418_v31  ;;  %v423_v50 = vshll.u32 %v422_v45, 16 }
 0x1b2   :  { %v398_v32 = vpop.permute.xlu1 %397 }
 0x1b3   :  { %401 = vst.msk [vmem:[#allocation2 + $0x4] sm:$0x3] %vm344_vm2, %v398_v32 }
 0x1b9   :  { %v444_v34 = vpop.xlane.xlu2 %443 }
 0x1ba   :  { %vm445_vm11 = vcmp.eq.f32.partialorder %v442_v19, %v444_v34  ;;  %v450_v58 = vcvt.f32.s32 %v444_v34 }
 0x1bb   :  { %v446_v36 = vsel %vm445_vm11, %v441_v35, inf }
 0x1bc   :  { %447 = vmin.xlane.f32.xlu2 %v446_v36  ;;  %v451_v60 = vshll.u32 %v450_v58, 16 }
 0x1c1   :  { %v370_v37 = vpop.permute.xlu2 %369 }
 0x1c2   :  { %373 = vst.msk [vmem:[#allocation2 + $0x2] sm:$0x3] %vm344_vm2, %v370_v37 }
 0x1c4   :  { %425 = vrot.lane.b32.xlu0 %v820_v53, %s687_s6 }
 0x211   :  { %v363_v38 = vpop.xlane.xlu0 %362 }
 0x212   :  { %v364_v44 = vcvt.f32.s32 %v363_v38 }
 0x214   :  { %v367_v48 = vadd.s32 %v366_v46, %v364_v44 }
 0x216   :  { %v453_v53 = vperm.slane %v367_v48, %v739_v9 }
 0x219   :  { %v392_v39 = vpop.xlane.xlu0 %391 }
 0x21a   :  { %v393_v42 = vcvt.f32.s32 %v392_v39 }
 0x21c   :  { %v396_v47 = vadd.s32 %v395_v43, %v393_v42 }
 0x21e   :  { %v454_v52 = vperm.slane %v396_v47, %v739_v9 }
 0x220   :  { %v458_v56 = vsel %vm457_vm12, %v453_v53, %v454_v52 }
 0x223   :  { %v420_v49 = vpop.xlane.xlu0 %419 }
 0x224   :  { %v421_v51 = vcvt.f32.s32 %v420_v49 }
 0x226   :  { %v424_v54 = vadd.s32 %v423_v50, %v421_v51 }
 0x228   :  { %v455_v55 = vperm.slane %v424_v54, %v739_v9 }
 0x22a   :  { %v460_v57 = vsel %vm459_vm13, %v458_v56, %v455_v55 }
 0x22f   :  { %v448_v59 = vpop.xlane.xlu2 %447 }
 0x230   :  { %v449_v61 = vcvt.f32.s32 %v448_v59 }
 0x232   :  { %v452_v62 = vadd.s32 %v451_v60, %v449_v61 }
 0x234   :  { %v456_v63 = vperm.slane %v452_v62, %v739_v9 }
 0x236   :  { %v462_v0 = vsel %vm461_vm14, %v460_v57, %v456_v63  ;;  %v426_v1 = vpop.permute.xlu0 %425 }
 0x237   :  { %464 = vst.msk [vmem:[%s866_s4] sm:$0xf] %vm463_vm15, %v462_v0 }
 0x238   :  { %429 = vst.msk [vmem:[#allocation2 + $0x6] sm:$0x3] %vm344_vm2, %v426_v1 }
 0x239   :  { %477 = dma.vmem_to_hbm [thread:$0]  %s470_s8, 128, %s472_s11, [#allocation3], %s683_s2, %s683_s2, %s689_s14  }
 0x23a   :  { %680 = dma.done.wait [#allocation3], 128  }
 0x23b   :  { %681 = vsyncadd [#allocation3], 4294967168 }
 0x23c   :  { %486 = vsyncpa [#allocation3], 1 }

</bundles_post_ra>
